<compile_context>
chip_gen: v6e
topology: v6e:2x2x1
jax: 0.10.0
libtpu: 0.0.40
codegen_flags: <defaults>
</compile_context>

<pallas_src>
import functools

import jax
import jax.numpy as jnp
from jax.experimental import pallas as pl
from jax.experimental.pallas import tpu as pltpu


def _round_up(n, m):
    return ((n + m - 1) // m) * m


def _vmem_budget_bytes():
    """Per-chip scoped-VMEM budget: 3/4 of physical capacity, capped at 96 MiB
    (~48 MiB on v7x's 64 MiB parts, 96 MiB on v5e/v6e's 128 MiB parts)."""
    try:
        cap = int(pltpu.get_tpu_info().vmem_capacity_bytes)
    except Exception:
        cap = 64 * 1024 * 1024       # conservative: v7x physical size
    return min((cap * 3) // 4, 96 * 1024 * 1024)


# ----------------------------- fused single-shot kernel -----------------------------

def _fused_class_block_kernel(x_ref, gamma_ref, beta_ref, w_ref, b_ref, o_ref, *,
                              n_rows):
    """x resident in VMEM: BN batch stats -> folded affine -> row L2 norm -> matmul."""
    x = x_ref[...]                                                       # (Bp, Dp) f32
    bp, dp = x.shape
    inv_n = jnp.float32(1.0 / float(n_rows))

    # Per-feature mean: sublane-partial sums (VALU) + one cross-sublane collapse.
    xg = x.reshape(bp // 8, 8, dp)
    mean = jnp.sum(jnp.sum(xg, axis=0), axis=0, keepdims=True) * inv_n   # (1, Dp)

    # Exact centered (biased) variance. Zero pad rows each contribute (0 - mean)^2;
    # subtract that out, then clamp at 0 against rounding.
    xc = x - mean
    xcg = (xc * xc).reshape(bp // 8, 8, dp)
    ssq = jnp.sum(jnp.sum(xcg, axis=0), axis=0, keepdims=True)           # (1, Dp)
    n_pad = float(bp - n_rows)
    var = jnp.maximum((ssq - n_pad * mean * mean) * inv_n, 0.0)

    # Fold BN into a single affine: f = x * scale + shift (one mul + one add).
    scale = gamma_ref[...] * jax.lax.rsqrt(var + 1e-5)                   # (1, Dp)
    shift = beta_ref[...] - mean * scale
    f = x * scale + shift                                                # (Bp, Dp)

    # Row L2 normalize: single rsqrt on the row sum-of-squares (EUP slot).
    ss = jnp.sum(f * f, axis=1, keepdims=True)                           # (Bp, 1)
    f = f * jax.lax.rsqrt(ss + 1e-16)

    # Lane-dense bf16 MXU matmul with f32 accumulation.
    out = jnp.dot(f.astype(jnp.bfloat16), w_ref[...],
                  preferred_element_type=jnp.float32)                    # (Bp, Cp)
    o_ref[...] = (out + b_ref[...]).astype(o_ref.dtype)


# ------------------------- streaming fallback (large batch) -------------------------

def _bn_stats_kernel(x_ref, gamma_ref, beta_ref, scale_ref, shift_ref,
                     sum8_ref, ssq8_ref, *, n_rows):
    """Pass 1: per-feature sum / sum-of-squares over the batch accumulated into
    (8, D) sublane-partial scratch; fold BN into (scale, shift) on the last step."""
    i = pl.program_id(0)

    @pl.when(i == 0)
    def _():
        sum8_ref[...] = jnp.zeros_like(sum8_ref)
        ssq8_ref[...] = jnp.zeros_like(ssq8_ref)

    x = x_ref[...]                                                       # (tm1, Dp)
    tm, dp = x.shape
    xg = x.reshape(tm // 8, 8, dp)
    sum8_ref[...] += jnp.sum(xg, axis=0)                                 # VALU adds
    ssq8_ref[...] += jnp.sum(xg * xg, axis=0)

    @pl.when(i == pl.num_programs(0) - 1)
    def _():
        inv_n = jnp.float32(1.0 / float(n_rows))
        mean = jnp.sum(sum8_ref[...], axis=0, keepdims=True) * inv_n     # (1, Dp)
        # Single-pass variance; clamped at 0 so rsqrt never sees a negative value.
        var = jnp.maximum(
            jnp.sum(ssq8_ref[...], axis=0, keepdims=True) * inv_n - mean * mean, 0.0)
        scale = gamma_ref[...] * jax.lax.rsqrt(var + 1e-5)
        scale_ref[...] = scale
        shift_ref[...] = beta_ref[...] - mean * scale


def _normalize_matmul_kernel(x_ref, scale_ref, shift_ref, w_ref, b_ref, o_ref):
    """Pass 2 (per B-tile): folded BN affine -> row L2 normalize -> bf16 MXU matmul."""
    f = x_ref[...] * scale_ref[...] + shift_ref[...]                     # (tm2, Dp)
    ss = jnp.sum(f * f, axis=1, keepdims=True)
    f = f * jax.lax.rsqrt(ss + 1e-16)
    out = jnp.dot(f.astype(jnp.bfloat16), w_ref[...],
                  preferred_element_type=jnp.float32)                    # (tm2, Cp)
    o_ref[...] = (out + b_ref[...]).astype(o_ref.dtype)


def _pick_pass1_tile(b_pad, d_pad, budget):
    """Largest B-tile (streaming reduction; no weights resident) that fits VMEM."""
    for t in (512, 256, 128, 64, 32, 16, 8):
        if b_pad % t == 0 and (2 * t * d_pad * 4 + 16 * d_pad * 4 + (1 << 20)) <= budget:
            return t
    return 8


def _pick_pass2_tile(b_pad, d_pad, c_pad, budget):
    """Largest B-tile fitting the VMEM budget, preferring >= 2 grid steps (v7x)."""
    best = None
    for t in (512, 256, 128, 64, 32, 16, 8):
        if b_pad % t != 0:
            continue
        bytes_ = (2 * t * d_pad * 4           # x tile (double-buffered)
                  + 2 * t * c_pad * 4         # out tile (double-buffered)
                  + 2 * d_pad * c_pad * 2     # bf16 weights (conservatively x2 buffers)
                  + 6 * d_pad * 4 + 2 * c_pad * 4
                  + (1 << 20))                # headroom for temporaries
        if bytes_ > budget:
            continue
        if best is None:
            best = t
        if b_pad // t >= 2:                   # keep >= 2 grid steps for v7x megacore
            return t
    # TODO(synk): very large class counts (weight alone over the VMEM budget) would
    # additionally need tiling over the class dimension.
    return best if best is not None else 8


# ------------------------------------ wrappers ------------------------------------

def prepare_class_block_params(gamma, beta, w_t, bias):
    """Pad/cast parameters once (hoisted out of the per-forward path).

    gamma/beta: BN weight/bias, shape (D,) or (1, D).
    w_t: PyTorch Linear weight transposed, shape (D, C).  bias: (C,) or (1, C).
    """
    D, C = w_t.shape
    d_pad = _round_up(D, 128)
    # v6e/v7x MXU N-dim is 256 wide: when the matmul is compute-bound (large D) pad
    # the class dim to 256 so it is fully used; 128 is optimal on v5e / mem-bound.
    lane = 256 if d_pad >= 1024 else 128
    c_pad = _round_up(C, lane)

    gamma_p = jnp.ones((1, d_pad), jnp.float32).at[:, :D].set(
        jnp.asarray(gamma).reshape(1, D).astype(jnp.float32))
    beta_p = jnp.zeros((1, d_pad), jnp.float32).at[:, :D].set(
        jnp.asarray(beta).reshape(1, D).astype(jnp.float32))
    w_p = jnp.zeros((d_pad, c_pad), jnp.bfloat16).at[:D, :C].set(
        jnp.asarray(w_t).astype(jnp.bfloat16))
    b_p = jnp.zeros((1, c_pad), jnp.float32).at[:, :C].set(
        jnp.asarray(bias).reshape(1, C).astype(jnp.float32))
    return dict(D=D, C=C, d_pad=d_pad, c_pad=c_pad,
                gamma=gamma_p, beta=beta_p, w=w_p, b=b_p)


def class_block_apply(x, params, *, force_two_pass=False, trim_output=True):
    """x: (B, D). Returns (B, C) float32 logits.
    With trim_output=False the zero-padded (B_pad, C_pad) slab is returned instead,
    avoiding the post-kernel slice when the consumer can mask pad columns itself."""
    B, D = x.shape
    assert D == params["D"], "input feature dim does not match the prepared params"
    d_pad, c_pad = params["d_pad"], params["c_pad"]
    budget = int(_vmem_budget_bytes())

    # --------------------------- fused single-kernel path ---------------------------
    b8 = max(_round_up(B, 8), 8)
    fused_bytes = (b8 * d_pad * (4 + 4 + 2)      # x + f32 intermediates + bf16 copy
                   + d_pad * c_pad * 2           # bf16 weights
                   + b8 * c_pad * 4              # f32 output
                   + 8 * d_pad * 4 + 2 * c_pad * 4)
    use_fused = (not force_two_pass) and fused_bytes <= (budget * 4) // 5

    if use_fused:
        x_pad = x.astype(jnp.float32)
        if (b8, d_pad) != (B, D):
            x_pad = jnp.zeros((b8, d_pad), jnp.float32).at[:B, :D].set(x_pad)
        out_pad = pl.pallas_call(
            functools.partial(_fused_class_block_kernel, n_rows=B),
            out_shape=jax.ShapeDtypeStruct((b8, c_pad), jnp.float32),
            compiler_params=pltpu.CompilerParams(vmem_limit_bytes=budget),
        )(x_pad, params["gamma"], params["beta"], params["w"], params["b"])
        if not trim_output:
            return out_pad
        return out_pad[:B, :params["C"]]

    # ------------------- streaming two-pass fallback (large batch) -------------------
    b_pad = _round_up(B, 256)
    x_pad = x.astype(jnp.float32)
    if (b_pad, d_pad) != (B, D):
        x_pad = jnp.zeros((b_pad, d_pad), jnp.float32).at[:B, :D].set(x_pad)

    # Pass 1: streaming reduction over B -> folded (scale, shift). Pass 1 carries no
    # weight tensor, so it uses the largest tile that fits VMEM (independent of tm2).
    tm1 = _pick_pass1_tile(b_pad, d_pad, budget)
    scale, shift = pl.pallas_call(
        functools.partial(_bn_stats_kernel, n_rows=B),
        out_shape=(jax.ShapeDtypeStruct((1, d_pad), jnp.float32),
                   jax.ShapeDtypeStruct((1, d_pad), jnp.float32)),
        grid_spec=pltpu.PrefetchScalarGridSpec(
            num_scalar_prefetch=0,
            grid=(b_pad // tm1,),
            in_specs=[
                pl.BlockSpec((tm1, d_pad), lambda i: (i, 0)),
                pl.BlockSpec((1, d_pad), lambda i: (0, 0)),
                pl.BlockSpec((1, d_pad), lambda i: (0, 0)),
            ],
            out_specs=[
                pl.BlockSpec((1, d_pad), lambda i: (0, 0)),
                pl.BlockSpec((1, d_pad), lambda i: (0, 0)),
            ],
            scratch_shapes=[pltpu.VMEM((8, d_pad), jnp.float32),
                            pltpu.VMEM((8, d_pad), jnp.float32)]),
        compiler_params=pltpu.CompilerParams(
            dimension_semantics=("arbitrary",),        # reduction over B
            vmem_limit_bytes=budget),
    )(x_pad, params["gamma"], params["beta"])

    # Pass 2: normalize + matmul, tiled over B ("parallel" -> megacore); tile sized
    # from the per-chip VMEM budget and chosen so the grid has >= 2 steps (v7x 2 TCs).
    # NOTE: w/bias/scale/shift have constant index maps; pipeline_mode=pl.Buffered(1)
    # (or a one-shot scratch copy) would drop their second buffer and buy a larger tm2.
    tm2 = _pick_pass2_tile(b_pad, d_pad, c_pad, budget)
    out_pad = pl.pallas_call(
        _normalize_matmul_kernel,
        out_shape=jax.ShapeDtypeStruct((b_pad, c_pad), jnp.float32),
        grid_spec=pltpu.PrefetchScalarGridSpec(
            num_scalar_prefetch=0,
            grid=(b_pad // tm2,),
            in_specs=[
                pl.BlockSpec((tm2, d_pad), lambda i: (i, 0)),      # x tile (pipelined)
                pl.BlockSpec((1, d_pad), lambda i: (0, 0)),        # scale (resident)
                pl.BlockSpec((1, d_pad), lambda i: (0, 0)),        # shift (resident)
                pl.BlockSpec((d_pad, c_pad), lambda i: (0, 0)),    # weights (resident)
                pl.BlockSpec((1, c_pad), lambda i: (0, 0)),        # bias (resident)
            ],
            out_specs=pl.BlockSpec((tm2, c_pad), lambda i: (i, 0)),
        ),
        compiler_params=pltpu.CompilerParams(
            dimension_semantics=("parallel",),
            vmem_limit_bytes=budget),
    )(x_pad, scale, shift, params["w"], params["b"])

    if not trim_output:
        return out_pad
    return out_pad[:B, :params["C"]]


def class_block_forward(x, gamma, beta, w_t, bias, *, force_two_pass=False,
                        trim_output=True):
    """Convenience wrapper; for repeated calls, call prepare_class_block_params once
    and reuse it with class_block_apply (avoids re-padding/casting the weights)."""
    params = prepare_class_block_params(gamma, beta, w_t, bias)
    return class_block_apply(x, params, force_two_pass=force_two_pass,
                             trim_output=trim_output)


if __name__ == "__main__":

    def reference(x, gamma, beta, w_t, bias):
        mean = jnp.mean(x, axis=0, keepdims=True)
        var = jnp.mean((x - mean) ** 2, axis=0, keepdims=True)
        f = (x - mean) * jax.lax.rsqrt(var + 1e-5) * gamma.reshape(1, -1) \
            + beta.reshape(1, -1)
        f = f / (jnp.linalg.norm(f, axis=1, keepdims=True) + 1e-8)
        return f @ w_t + bias.reshape(1, -1)

    def make_inputs(key, B, D, C):
        kx, kg, kw = jax.random.split(key, 3)
        x = jax.random.normal(kx, (B, D), dtype=jnp.float32)
        # BatchNorm1d per weights_init_kaiming: weight ~ N(1.0, 0.02), bias = 0.
        gamma = (1.0 + 0.02 * jax.random.normal(kg, (D,))).astype(jnp.float32)
        beta = jnp.zeros((D,), dtype=jnp.float32)
        # Linear per weights_init_classifier: weight ~ N(0, 0.001), bias = 0.
        w = (0.001 * jax.random.normal(kw, (C, D))).astype(jnp.float32)
        return x, gamma, beta, w.T, jnp.zeros((C,), jnp.float32)

    key = jax.random.PRNGKey(0)
    k1, k2, k3 = jax.random.split(key, 3)

    # 1) Typical small shape: fused single-kernel path (x read from HBM once).
    x, gamma, beta, w_t, bias = make_inputs(k1, 64, 128, 16)
    params = prepare_class_block_params(gamma, beta, w_t, bias)  # hoisted pad/cast
    out = class_block_apply(x, params)
    jax.block_until_ready(out)
    ref = reference(x, gamma, beta, w_t, bias)
    assert out.shape == ref.shape
    assert jnp.allclose(out, ref, atol=1e-4, rtol=2e-2), "fused path mismatch"

    # 2) Ragged shapes (B, D, C all off-alignment): fused path with zero padding and
    #    the pad-row correction inside the in-kernel variance.
    x, gamma, beta, w_t, bias = make_inputs(k2, 30, 96, 20)
    out = class_block_forward(x, gamma, beta, w_t, bias)
    jax.block_until_ready(out)
    ref = reference(x, gamma, beta, w_t, bias)
    assert out.shape == ref.shape
    assert jnp.allclose(out, ref, atol=1e-4, rtol=2e-2), "padded fused path mismatch"

    # 3) Force the streaming two-pass fallback (the large-batch path) on a ragged
    #    batch so its padding/masking and parallel pass-2 grid are exercised too.
    x, gamma, beta, w_t, bias = make_inputs(k3, 300, 96, 20)
    out = class_block_forward(x, gamma, beta, w_t, bias, force_two_pass=True)
    jax.block_until_ready(out)
    ref = reference(x, gamma, beta, w_t, bias)
    assert out.shape == ref.shape
    assert jnp.allclose(out, ref, atol=1e-4, rtol=2e-2), "two-pass path mismatch"

    print("KERNEL_OK")
</pallas_src>

<mosaic_0001>
module attributes {stable_mosaic.version = 11 : i64} {
  func.func @_fused_class_block_kernel(%arg0: memref<64x128xf32, #tpu.memory_space<vmem>>, %arg1: memref<1x128xf32, #tpu.memory_space<vmem>>, %arg2: memref<1x128xf32, #tpu.memory_space<vmem>>, %arg3: memref<128x128xbf16, #tpu.memory_space<vmem>>, %arg4: memref<1x128xf32, #tpu.memory_space<vmem>>, %arg5: memref<64x128xf32, #tpu.memory_space<vmem>>) attributes {dimension_semantics = [], scalar_prefetch = 0 : i64, scratch_operands = 0 : i64, tpu.core_type = #tpu.core_type<tc>} {
    %c0 = arith.constant 0 : index
    %c0_0 = arith.constant 0 : index
    %0 = vector.load %arg0[%c0, %c0_0] : memref<64x128xf32, #tpu.memory_space<vmem>>, vector<64x128xf32>
    %1 = vector.shape_cast %0 : vector<64x128xf32> to vector<8x8x128xf32>
    %cst = arith.constant dense<0.000000e+00> : vector<8x128xf32>
    %2 = vector.multi_reduction <add>, %1, %cst [0] : vector<8x8x128xf32> to vector<8x128xf32>
    %cst_1 = arith.constant dense<0.000000e+00> : vector<128xf32>
    %3 = vector.multi_reduction <add>, %2, %cst_1 [0] : vector<8x128xf32> to vector<128xf32>
    %4 = vector.shape_cast %3 : vector<128xf32> to vector<1x128xf32>
    %cst_2 = arith.constant 1.562500e-02 : f32
    %5 = vector.broadcast %cst_2 : f32 to vector<1x128xf32>
    %6 = arith.mulf %4, %5 : vector<1x128xf32>
    %7 = vector.broadcast %6 : vector<1x128xf32> to vector<64x128xf32>
    %8 = arith.subf %0, %7 : vector<64x128xf32>
    %9 = arith.mulf %8, %8 : vector<64x128xf32>
    %10 = vector.shape_cast %9 : vector<64x128xf32> to vector<8x8x128xf32>
    %cst_3 = arith.constant dense<0.000000e+00> : vector<8x128xf32>
    %11 = vector.multi_reduction <add>, %10, %cst_3 [0] : vector<8x8x128xf32> to vector<8x128xf32>
    %cst_4 = arith.constant dense<0.000000e+00> : vector<128xf32>
    %12 = vector.multi_reduction <add>, %11, %cst_4 [0] : vector<8x128xf32> to vector<128xf32>
    %13 = vector.shape_cast %12 : vector<128xf32> to vector<1x128xf32>
    %cst_5 = arith.constant 0.000000e+00 : f32
    %14 = vector.broadcast %cst_5 : f32 to vector<1x128xf32>
    %15 = arith.mulf %14, %6 : vector<1x128xf32>
    %16 = arith.mulf %15, %6 : vector<1x128xf32>
    %17 = arith.subf %13, %16 : vector<1x128xf32>
    %cst_6 = arith.constant 1.562500e-02 : f32
    %18 = vector.broadcast %cst_6 : f32 to vector<1x128xf32>
    %19 = arith.mulf %17, %18 : vector<1x128xf32>
    %cst_7 = arith.constant 0.000000e+00 : f32
    %20 = vector.broadcast %cst_7 : f32 to vector<1x128xf32>
    %21 = arith.maximumf %19, %20 : vector<1x128xf32>
    %c0_8 = arith.constant 0 : index
    %c0_9 = arith.constant 0 : index
    %22 = vector.load %arg1[%c0_8, %c0_9] : memref<1x128xf32, #tpu.memory_space<vmem>>, vector<1x128xf32>
    %cst_10 = arith.constant 9.99999974E-6 : f32
    %23 = vector.broadcast %cst_10 : f32 to vector<1x128xf32>
    %24 = arith.addf %21, %23 : vector<1x128xf32>
    %25 = math.rsqrt %24 : vector<1x128xf32>
    %26 = arith.mulf %22, %25 : vector<1x128xf32>
    %c0_11 = arith.constant 0 : index
    %c0_12 = arith.constant 0 : index
    %27 = vector.load %arg2[%c0_11, %c0_12] : memref<1x128xf32, #tpu.memory_space<vmem>>, vector<1x128xf32>
    %28 = arith.mulf %6, %26 : vector<1x128xf32>
    %29 = arith.subf %27, %28 : vector<1x128xf32>
    %30 = vector.broadcast %26 : vector<1x128xf32> to vector<64x128xf32>
    %31 = arith.mulf %0, %30 : vector<64x128xf32>
    %32 = vector.broadcast %29 : vector<1x128xf32> to vector<64x128xf32>
    %33 = arith.addf %31, %32 : vector<64x128xf32>
    %34 = arith.mulf %33, %33 : vector<64x128xf32>
    %cst_13 = arith.constant dense<0.000000e+00> : vector<64xf32>
    %35 = vector.multi_reduction <add>, %34, %cst_13 [1] : vector<64x128xf32> to vector<64xf32>
    %36 = vector.shape_cast %35 : vector<64xf32> to vector<64x1xf32>
    %cst_14 = arith.constant 1.000000e-16 : f32
    %37 = vector.broadcast %cst_14 : f32 to vector<64x1xf32>
    %38 = arith.addf %36, %37 : vector<64x1xf32>
    %39 = math.rsqrt %38 : vector<64x1xf32>
    %40 = vector.broadcast %39 : vector<64x1xf32> to vector<64x128xf32>
    %41 = arith.mulf %33, %40 : vector<64x128xf32>
    %42 = arith.truncf %41 : vector<64x128xf32> to vector<64x128xbf16>
    %c0_15 = arith.constant 0 : index
    %c0_16 = arith.constant 0 : index
    %43 = vector.load %arg3[%c0_15, %c0_16] : memref<128x128xbf16, #tpu.memory_space<vmem>>, vector<128x128xbf16>
    %cst_17 = arith.constant dense<0.000000e+00> : vector<64x128xf32>
    %44 = tpu.matmul %42, %43, %cst_17 {dimension_numbers = #tpu.dot_dimension_numbers<[1], [0], [0], [1], [0, 0, 1, 1], [], []>} : vector<64x128xbf16>, vector<128x128xbf16>, vector<64x128xf32> -> vector<64x128xf32>
    %c0_18 = arith.constant 0 : index
    %c0_19 = arith.constant 0 : index
    %45 = vector.load %arg4[%c0_18, %c0_19] : memref<1x128xf32, #tpu.memory_space<vmem>>, vector<1x128xf32>
    %46 = vector.broadcast %45 : vector<1x128xf32> to vector<64x128xf32>
    %47 = arith.addf %44, %46 : vector<64x128xf32>
    %c0_20 = arith.constant 0 : index
    %c0_21 = arith.constant 0 : index
    %48 = vector.load %arg5[%c0_20, %c0_21] : memref<64x128xf32, #tpu.memory_space<vmem>>, vector<64x128xf32>
    tpu.vector_store %arg5[%c0_20, %c0_21], %47 {strides = array<i32>} : memref<64x128xf32, #tpu.memory_space<vmem>>, vector<64x128xf32>,
    return
  }
}

</mosaic_0001>

<bundles_post_ra>
// kernel: tpu_custom_call.1
= control target key start
LH: loop header
LB: loop body
LE: loop exit
PB: predicated region body
PF: predicated region fallthrough
CT: control target
= control target key end

     0   :  { %10 = vsyncpa [#allocation3], 0  ;;  %s656_s0 = inlined_call_operand.hbm [shape: f32[64,128], index: 0, kind: input, shape index: {}]   ;;  %s657_s1 = inlined_call_operand.vmem [shape: f32[1,128], index: 1, kind: input, shape index: {}]   ;;  %s658_s2 = inlined_call_operand.vmem [shape: f32[1,128], index: 2, kind: input, shape index: {}]   ;;  %s659_s3 = inlined_call_operand.hbm [shape: bf16[128,128], index: 3, kind: input, shape index: {}]   ;;  %s660_s4 = inlined_call_operand.vmem [shape: f32[1,128], index: 4, kind: input, shape index: {}]   ;;  %s661_s5 = inlined_call_operand.hbm [shape: f32[64,128], index: 5, kind: output, shape index: {}]  }
   0x1   :  { %11 = vsyncpa [#allocation6], 0 }
   0x2   :  { %12 = vsyncpa [#allocation4], 0  ;;  %s515_s18 = smov [#allocation2]  }
   0x3   :  { %s18_s19 = sshll.u32 %s515_s18, 4  ;;  %s19_s19 = int_to_ptr.vmem [resolvable:$true] %s18_s19 }
   0x4   :  { %s457_s20 = scalar_lea.vmem %s19_s19, 1024  ;;  %p462_p1 = scmp.lt.s32.totalorder %s19_s19, %s19_s19 }
   0x5   :  { %p458_p0 = scmp.ne.s32.totalorder %s19_s19, %s457_s20  ;;  %p463_p2 = scmp.lt.s32.totalorder %s457_s20, %s457_s20 }
   0x7   :  { %p464_p3 = por %p463_p2, %p462_p1 }
   0x9   :  { %p465_p4 = pnand %p464_p3, %p458_p0 }
   0xb   :  { %468 = shalt.err (!%p465_p4)
}
   0xc   :  { %s516_s21 = smov 128   ;;  %s517_s22 = smov 8  }
   0xd   :  { %24 = dma.hbm_to_vmem [thread:$0]  %s656_s0, 1024, %s19_s19, [#allocation3], %s516_s21, %s516_s21, %s517_s22  }
   0xe   :  { %s518_s25 = smov [#allocation5]  }
   0xf   :  { %s34_s26 = sshll.u32 %s518_s25, 4  ;;  %s35_s26 = int_to_ptr.vmem [resolvable:$true] %s34_s26 }
  0x10   :  { %s477_s27 = scalar_lea.vmem %s35_s26, 1024  ;;  %p482_p6 = scmp.lt.s32.totalorder %s35_s26, %s35_s26 }
  0x11   :  { %p478_p5 = scmp.ne.s32.totalorder %s35_s26, %s477_s27  ;;  %p483_p7 = scmp.lt.s32.totalorder %s477_s27, %s477_s27 }
  0x13   :  { %p484_p8 = por %p483_p7, %p482_p6 }
  0x15   :  { %p485_p9 = pnand %p484_p8, %p478_p5 }
  0x17   :  { %488 = shalt.err (!%p485_p9)
}
  0x18   :  { %s519_s28 = smov 64   ;;  %s520_s29 = smov 4  }
  0x19   :  { %40 = dma.hbm_to_vmem [thread:$0]  %s659_s3, 1024, %s35_s26, [#allocation6], %s519_s28, %s519_s28, %s520_s29  }
  0x1a   :  { %509 = dma.done.wait [#allocation3], 1024  }
  0x1b   :  { %510 = vsyncadd [#allocation3], 4294966272 }
  0x1c   :  { %511 = dma.done.wait [#allocation6], 1024  }
  0x1d   :  { %512 = vsyncadd [#allocation6], 4294966272  ;;  %v561_v0 = vld [vmem:[#allocation2] sm:$0xff]  ;;  %v563_v1 = vld [vmem:[#allocation2 + $0x8] sm:$0xff]  ;;  %v114_v58 = vlaneseq  ;;  %s521_s9 = smov [#allocation7]  }
  0x1e   :  { %v565_v2 = vld [vmem:[#allocation2 + $0x10] sm:$0xff]  ;;  %v58_v3 = vadd.f32 %v563_v1, %v561_v0  ;;  %v569_v4 = vld [vmem:[#allocation2 + $0x18] sm:$0xff]  ;;  %v571_v5 = vld [vmem:[#allocation2 + $0x20] sm:$0xff]  ;;  %s342_s10 = sshll.u32 %s521_s9, 4  ;;  %s343_s10 = int_to_ptr.vmem [resolvable:$true] %s342_s10 }
  0x1f   :  { %v574_v7 = vld [vmem:[#allocation2 + $0x28] sm:$0xff]  ;;  %v423_v8 = vld [vmem:[#allocation5 + $0x38] sm:$0xff]   ;;  %v577_v10 = vld [vmem:[#allocation2 + $0x30] sm:$0xff]  ;;  %v115_v59 = vshrl.u32 %v114_v58, 7  ;;  %p494_p11 = scmp.lt.s32.totalorder %s343_s10, %s343_s10 }
  0x20   :  { %v59_v6 = vadd.f32 %v58_v3, %v565_v2  ;;  %376 = vmatprep.subr.bf16.mxu0 %v423_v8  ;;  %400 = vmatprep.subr.bf16.mxu1 %v423_v8  ;;  %v581_v13 = vld [vmem:[#allocation2 + $0x38] sm:$0xff]  ;;  %v106_v60 = vld [vmem:[%s657_s1] sm:$0x1] }
  0x21   :  { %377 = vmatpush3.bf16.msra.mxu0 %v423_v8  ;;  %408 = vmatpush3.bf16.msra.mxu1 %v423_v8  ;;  %v116_v61 = vsub.s32 0, %v115_v59  ;;  %v110_v3 = vld [vmem:[%s658_s2] sm:$0x1] }
  0x22   :  { %v60_v9 = vadd.f32 %v59_v6, %v569_v4 }
  0x24   :  { %v61_v11 = vadd.f32 %v60_v9, %v571_v5 }
  0x26   :  { %v62_v12 = vadd.f32 %v61_v11, %v574_v7 }
  0x28   :  { %v63_v14 = vadd.f32 %v62_v12, %v577_v10 }
  0x2a   :  { %v64_v15 = vadd.f32 %v63_v14, %v581_v13 }
  0x2c   :  { %v65_v16 = vrot.slane %v64_v15, 4 }
  0x2e   :  { %v66_v17 = vadd.f32 %v65_v16, %v64_v15 }
  0x30   :  { %v67_v18 = vrot.slane %v66_v17, 2 }
  0x32   :  { %v68_v19 = vadd.f32 %v67_v18, %v66_v17 }
  0x34   :  { %v69_v20 = vrot.slane %v68_v19, 1 }
  0x36   :  { %v70_v21 = vadd.f32 %v69_v20, %v68_v19 }
  0x38   :  { %v71_v22 = vmul.f32 0.015625, %v70_v21 }
  0x3a   :  { %v72_v23 = vsub.f32 %v561_v0, %v71_v22  ;;  %v73_v24 = vsub.f32 %v563_v1, %v71_v22  ;;  %v74_v25 = vsub.f32 %v565_v2, %v71_v22  ;;  %v75_v26 = vsub.f32 %v569_v4, %v71_v22 }
  0x3b   :  { %v76_v27 = vsub.f32 %v571_v5, %v71_v22  ;;  %v77_v31 = vsub.f32 %v574_v7, %v71_v22  ;;  %v78_v34 = vsub.f32 %v577_v10, %v71_v22  ;;  %v79_v37 = vsub.f32 %v581_v13, %v71_v22 }
  0x3c   :  { %v80_v28 = vmul.f32 %v72_v23, %v72_v23  ;;  %v81_v29 = vmul.f32 %v73_v24, %v73_v24  ;;  %v82_v30 = vmul.f32 %v74_v25, %v74_v25  ;;  %v83_v32 = vmul.f32 %v75_v26, %v75_v26 }
  0x3d   :  { %v84_v35 = vmul.f32 %v76_v27, %v76_v27  ;;  %v85_v38 = vmul.f32 %v77_v31, %v77_v31  ;;  %v86_v40 = vmul.f32 %v78_v34, %v78_v34  ;;  %v87_v42 = vmul.f32 %v79_v37, %v79_v37  ;;  %v426_v31 = vld [vmem:[#allocation5 + $0x20] sm:$0xff]   ;;  %v429_v34 = vld [vmem:[#allocation5 + $0x8] sm:$0xff]  }
  0x3e   :  { %v88_v33 = vadd.f32 %v81_v29, %v80_v28  ;;  %v101_v49 = vmul.f32 0.0, %v71_v22  ;;  %v424_v29 = vld [vmem:[#allocation5 + $0x30] sm:$0xff]  }
  0x3f   :  { %378 = vmatprep.subr.bf16.mxu0 %v424_v29  ;;  %401 = vmatprep.subr.bf16.mxu1 %v424_v29 }
  0x40   :  { %v89_v36 = vadd.f32 %v88_v33, %v82_v30  ;;  %v102_v52 = vmul.f32 %v101_v49, %v71_v22  ;;  %379 = vmatpush3.bf16.msra.mxu0 %v424_v29  ;;  %v425_v30 = vld [vmem:[#allocation5 + $0x28] sm:$0xff]   ;;  %409 = vmatpush3.bf16.msra.mxu1 %v424_v29  ;;  %v428_v33 = vld [vmem:[#allocation5 + $0x10] sm:$0xff]  }
  0x41   :  { %380 = vmatprep.subr.bf16.mxu0 %v425_v30  ;;  %402 = vmatprep.subr.bf16.mxu1 %v425_v30 }
  0x42   :  { %v90_v39 = vadd.f32 %v89_v36, %v83_v32  ;;  %v427_v32 = vld [vmem:[#allocation5 + $0x18] sm:$0xff]  }
  0x44   :  { %v91_v41 = vadd.f32 %v90_v39, %v84_v35  ;;  %381 = vmatpush3.bf16.msra.mxu0 %v425_v30  ;;  %410 = vmatpush3.bf16.msra.mxu1 %v425_v30  ;;  %v430_v35 = vld [vmem:[#allocation5] sm:$0xff]  }
  0x45   :  { %382 = vmatprep.subr.bf16.mxu0 %v426_v31  ;;  %403 = vmatprep.subr.bf16.mxu1 %v426_v31 }
  0x46   :  { %v92_v43 = vadd.f32 %v91_v41, %v85_v38 }
  0x48   :  { %v93_v44 = vadd.f32 %v92_v43, %v86_v40  ;;  %383 = vmatpush3.bf16.msra.mxu0 %v426_v31  ;;  %411 = vmatpush3.bf16.msra.mxu1 %v426_v31 }
  0x49   :  { %384 = vmatprep.subr.bf16.mxu0 %v427_v32  ;;  %404 = vmatprep.subr.bf16.mxu1 %v427_v32 }
  0x4a   :  { %v94_v45 = vadd.f32 %v93_v44, %v87_v42 }
  0x4c   :  { %v95_v46 = vrot.slane %v94_v45, 4  ;;  %385 = vmatpush3.bf16.msra.mxu0 %v427_v32  ;;  %412 = vmatpush3.bf16.msra.mxu1 %v427_v32 }
  0x4d   :  { %386 = vmatprep.subr.bf16.mxu0 %v428_v33  ;;  %405 = vmatprep.subr.bf16.mxu1 %v428_v33 }
  0x4e   :  { %v96_v47 = vadd.f32 %v95_v46, %v94_v45 }
  0x50   :  { %v97_v48 = vrot.slane %v96_v47, 2  ;;  %387 = vmatpush3.bf16.msra.mxu0 %v428_v33  ;;  %413 = vmatpush3.bf16.msra.mxu1 %v428_v33 }
  0x51   :  { %388 = vmatprep.subr.bf16.mxu0 %v429_v34  ;;  %406 = vmatprep.subr.bf16.mxu1 %v429_v34 }
  0x52   :  { %v98_v50 = vadd.f32 %v97_v48, %v96_v47 }
  0x54   :  { %v99_v51 = vrot.slane %v98_v50, 1  ;;  %389 = vmatpush3.bf16.msra.mxu0 %v429_v34  ;;  %414 = vmatpush3.bf16.msra.mxu1 %v429_v34 }
  0x55   :  { %390 = vmatprep.subr.bf16.mxu0 %v430_v35  ;;  %407 = vmatprep.subr.bf16.mxu1 %v430_v35 }
  0x56   :  { %v100_v53 = vadd.f32 %v99_v51, %v98_v50 }
  0x58   :  { %v103_v54 = vsub.f32 %v100_v53, %v102_v52  ;;  %391 = vmatpush3.bf16.msra.mxu0 %v430_v35  ;;  %415 = vmatpush3.bf16.msra.mxu1 %v430_v35 }
  0x5a   :  { %v104_v55 = vmul.f32 0.015625, %v103_v54 }
  0x5c   :  { %v105_v56 = vmax.f32 %v104_v55, 0.0 }
  0x5e   :  { %v107_v57 = vadd.f32 1e-05, %v105_v56 }
  0x60   :  { %431 = vrsqrt.f32 %v107_v57 }
  0x6d   :  { %v432_v62 = vpop.eup %431 }
  0x6e   :  { %v109_v63 = vmul.f32 %v432_v62, %v106_v60 }
  0x70   :  { %v111_v6 = vmul.f32 %v109_v63, %v71_v22  ;;  %v117_v8 = vrot.slane %v109_v63, %v116_v61 }
  0x72   :  { %v112_v9 = vsub.f32 %v110_v3, %v111_v6  ;;  %v123_v11 = vmul.f32 %v117_v8, %v571_v5  ;;  %v119_v12 = vmul.f32 %v117_v8, %v561_v0  ;;  %v124_v14 = vmul.f32 %v117_v8, %v574_v7 }
  0x73   :  { %v120_v15 = vmul.f32 %v117_v8, %v563_v1  ;;  %v122_v17 = vmul.f32 %v117_v8, %v569_v4  ;;  %v121_v18 = vmul.f32 %v117_v8, %v565_v2  ;;  %v126_v4 = vmul.f32 %v117_v8, %v581_v13 }
  0x74   :  { %v131_v16 = vrot.slane %v112_v9, %v116_v61  ;;  %v125_v2 = vmul.f32 %v117_v8, %v577_v10 }
  0x76   :  { %v605_v19 = vadd.f32 %v131_v16, %v123_v11  ;;  %v607_v20 = vadd.f32 %v131_v16, %v119_v12  ;;  %v609_v21 = vadd.f32 %v131_v16, %v124_v14  ;;  %v611_v22 = vadd.f32 %v131_v16, %v120_v15 }
  0x77   :  { %v617_v1 = vadd.f32 %v131_v16, %v122_v17  ;;  %v625_v24 = vadd.f32 %v131_v16, %v121_v18  ;;  %v627_v25 = vadd.f32 %v131_v16, %v126_v4  ;;  %v633_v13 = vadd.f32 %v131_v16, %v125_v2  ;;  %v355_v16 = vld [vmem:[%s660_s4] ss:$0 sm:$0xff]  ;;  %s489_s4 = scalar_lea.vmem %s343_s10, 1024 }
  0x78   :  { %v145_v0 = vmul.f32 %v605_v19, %v605_v19  ;;  %v141_v5 = vmul.f32 %v607_v20, %v607_v20  ;;  %v146_v7 = vmul.f32 %v609_v21, %v609_v21  ;;  %v142_v23 = vmul.f32 %v611_v22, %v611_v22  ;;  %p490_p10 = scmp.ne.s32.totalorder %s343_s10, %s489_s4  ;;  %p495_p12 = scmp.lt.s32.totalorder %s489_s4, %s489_s4 }
  0x79   :  { %v144_v26 = vmul.f32 %v617_v1, %v617_v1  ;;  %v143_v10 = vmul.f32 %v625_v24, %v625_v24  ;;  %v148_v27 = vmul.f32 %v627_v25, %v627_v25  ;;  %v147_v28 = vmul.f32 %v633_v13, %v633_v13 }
  0x7a   :  { %157 = vadd.xlane.f32.xlu1 %v145_v0  ;;  %149 = vadd.xlane.f32.xlu0 %v141_v5  ;;  %p496_p13 = por %p495_p12, %p494_p11 }
  0x7c   :  { %p497_p0 = pnand %p496_p13, %p490_p10 }
  0x7e   :  { %159 = vadd.xlane.f32.xlu1 %v146_v7  ;;  %151 = vadd.xlane.f32.xlu0 %v142_v23 }
  0x82   :  { %155 = vadd.xlane.f32.xlu1 %v144_v26  ;;  %153 = vadd.xlane.f32.xlu0 %v143_v10 }
  0x86   :  { %163 = vadd.xlane.f32.xlu1 %v148_v27  ;;  %161 = vadd.xlane.f32.xlu0 %v147_v28 }
 0x103   :  { %v158_v36 = vpop.xlane.xlu1 %157  ;;  %v150_v37 = vpop.xlane.xlu0 %149 }
 0x104   :  { %v169_v38 = vadd.f32 1e-16, %v158_v36  ;;  %v165_v39 = vadd.f32 1e-16, %v150_v37 }
 0x106   :  { %433 = vrsqrt.f32 %v169_v38 }
 0x107   :  { %v160_v40 = vpop.xlane.xlu1 %159  ;;  %v152_v41 = vpop.xlane.xlu0 %151  ;;  %435 = vrsqrt.f32 %v165_v39 }
 0x108   :  { %v170_v42 = vadd.f32 1e-16, %v160_v40  ;;  %v166_v43 = vadd.f32 1e-16, %v152_v41 }
 0x10a   :  { %437 = vrsqrt.f32 %v170_v42 }
 0x10b   :  { %439 = vrsqrt.f32 %v166_v43  ;;  %v156_v44 = vpop.xlane.xlu1 %155  ;;  %v154_v45 = vpop.xlane.xlu0 %153 }
 0x10c   :  { %v168_v46 = vadd.f32 1e-16, %v156_v44  ;;  %v167_v47 = vadd.f32 1e-16, %v154_v45 }
 0x10e   :  { %441 = vrsqrt.f32 %v168_v46 }
 0x10f   :  { %443 = vrsqrt.f32 %v167_v47  ;;  %v164_v48 = vpop.xlane.xlu1 %163  ;;  %v162_v49 = vpop.xlane.xlu0 %161 }
 0x110   :  { %v172_v50 = vadd.f32 1e-16, %v164_v48  ;;  %v171_v51 = vadd.f32 1e-16, %v162_v49 }
 0x112   :  { %445 = vrsqrt.f32 %v172_v50 }
 0x113   :  { %447 = vrsqrt.f32 %v171_v51  ;;  %v434_v52 = vpop.eup %433 }
 0x114   :  { %v436_v53 = vpop.eup %435  ;;  %v185_v56 = vmul.f32 %v434_v52, %v605_v19 }
 0x115   :  { %v181_v58 = vmul.f32 %v436_v53, %v607_v20 }
 0x117   :  { %v438_v54 = vpop.eup %437 }
 0x118   :  { %v440_v55 = vpop.eup %439  ;;  %v186_v57 = vmul.f32 %v438_v54, %v609_v21 }
 0x119   :  { %v182_v59 = vmul.f32 %v440_v55, %v611_v22 }
 0x11a   :  { %v191_v60 = vpack.c.bf16 %v186_v57, %v185_v56 }
 0x11b   :  { %v442_v61 = vpop.eup %441  ;;  %v189_v62 = vpack.c.bf16 %v182_v59, %v181_v58 }
 0x11c   :  { %v444_v63 = vpop.eup %443  ;;  %396 = vmatprep.mubr.bf16.mxu1 %v191_v60  ;;  %v184_v3 = vmul.f32 %v442_v61, %v617_v1 }
 0x11d   :  { %392 = vmatprep.mubr.bf16.mxu0 %v189_v62  ;;  %v183_v6 = vmul.f32 %v444_v63, %v625_v24 }
 0x11f   :  { %v446_v8 = vpop.eup %445  ;;  %v190_v9 = vpack.c.bf16 %v184_v3, %v183_v6 }
 0x120   :  { %v448_v11 = vpop.eup %447  ;;  %v188_v12 = vmul.f32 %v446_v8, %v627_v25 }
 0x121   :  { %393 = vmatmul.mubr.bf16.vlgmr.msra.gmra.mxu0 %v190_v9  ;;  %v187_v14 = vmul.f32 %v448_v11, %v633_v13 }
 0x123   :  { %v192_v15 = vpack.c.bf16 %v188_v12, %v187_v14 }
 0x125   :  { %397 = vmatmul.mubr.bf16.vlgmr.msra.gmra.mxu1 %v192_v15 }
 0x1e1   :  { %v394_v17 = vpop.f32.mrf.mxu0 }
 0x1e2   :  { %v307_v18 = vadd.f32 %v394_v17, %v355_v16 }
 0x1e3   :  { %v298_v19 = vpop.f32.mrf.mxu0 }
 0x1e4   :  { %331 = vst [vmem:[#allocation7 + $0x10] sm:$0xff] %v307_v18  ;;  %v299_v20 = vadd.f32 %v355_v16, %v298_v19 }
 0x1e5   :  { %v395_v21 = vpop.f32.mrf.mxu0  ;;  %v398_v22 = vpop.f32.mrf.mxu1 }
 0x1e6   :  { %329 = vst [vmem:[#allocation7] sm:$0xff] %v299_v20  ;;  %v310_v0 = vadd.f32 %v395_v21, %v355_v16  ;;  %v323_v5 = vadd.f32 %v398_v22, %v355_v16 }
 0x1e7   :  { %v301_v1 = vpop.f32.mrf.mxu0  ;;  %v314_v4 = vpop.f32.mrf.mxu1 }
 0x1e8   :  { %332 = vst [vmem:[#allocation7 + $0x18] sm:$0xff] %v310_v0  ;;  %335 = vst [vmem:[#allocation7 + $0x30] sm:$0xff] %v323_v5  ;;  %v302_v2 = vadd.f32 %v355_v16, %v301_v1  ;;  %v315_v7 = vadd.f32 %v355_v16, %v314_v4 }
 0x1e9   :  { %v399_v23 = vpop.f32.mrf.mxu1 }
 0x1ea   :  { %330 = vst [vmem:[#allocation7 + $0x8] sm:$0xff] %v302_v2  ;;  %333 = vst [vmem:[#allocation7 + $0x20] sm:$0xff] %v315_v7  ;;  %v326_v24 = vadd.f32 %v399_v23, %v355_v16 }
 0x1eb   :  { %v317_v25 = vpop.f32.mrf.mxu1 }
 0x1ec   :  { %336 = vst [vmem:[#allocation7 + $0x38] sm:$0xff] %v326_v24  ;;  %v318_v26 = vadd.f32 %v355_v16, %v317_v25 }
 0x1ee   :  { %334 = vst [vmem:[#allocation7 + $0x28] sm:$0xff] %v318_v26 }
 0x1ef   :  { %500 = shalt.err (!%p497_p0)
}
 0x1f0   :  { %348 = dma.vmem_to_hbm [thread:$0]  %s343_s10, 1024, %s661_s5, [#allocation4], %s516_s21, %s516_s21, %s517_s22  }
 0x1f1   :  { %513 = dma.done.wait [#allocation4], 1024  }
 0x1f2   :  { %514 = vsyncadd [#allocation4], 4294966272 }
 0x1f3   :  { %352 = vsyncpa [#allocation3], 1 }
 0x1f4   :  { %353 = vsyncpa [#allocation6], 1 }
 0x1f5   :  { %354 = vsyncpa [#allocation4], 1 }

</bundles_post_ra>
